<compile_context>
chip_gen: v5e
topology: v5e:2x2
jax: 0.10.0
libtpu: 0.0.40
codegen_flags: <defaults>
</compile_context>

<pallas_src>
import functools

import jax
import jax.numpy as jnp
from jax import lax
from jax.experimental import pallas as pl
from jax.experimental.pallas import tpu as pltpu

_VMEM_LIMIT = 32 * 1024 * 1024  # safe on v5e/v6e/v7x; tiles below use ~2 MiB


def _pick_tile(dim, target):
    """Largest tile <= target that evenly divides `dim` (falls back to full)."""
    if dim <= target:
        return dim
    if dim % target == 0:
        return target
    return dim  # full extent is always a legal block shape


# ----------------------------------------------------------------------------
# Fused (stacked) Q/K/V projection: out[p] = xs[p] @ ws[p]
# ----------------------------------------------------------------------------
def _qkv_proj_kernel(x_ref, w_ref, o_ref, acc_ref):
    # x: (1, tm, tk), w: (1, tk, tn), o: (1, tm, tn), acc: (tm, tn) f32
    @pl.when(pl.program_id(3) == 0)
    def _():
        acc_ref[...] = jnp.zeros_like(acc_ref)

    acc_ref[...] += jnp.dot(x_ref[0], w_ref[0],
                            preferred_element_type=jnp.float32)

    @pl.when(pl.program_id(3) == pl.num_programs(3) - 1)
    def _():
        o_ref[0] = acc_ref[...].astype(o_ref.dtype)


def qkv_projection(xs, ws, *, tm=256, tn=256, tk=256):
    """xs: (3, M, K), ws: (3, K, N) -> (3, M, N)."""
    P, M, K = xs.shape
    N = ws.shape[2]
    tm, tn, tk = _pick_tile(M, tm), _pick_tile(N, tn), _pick_tile(K, tk)
    return pl.pallas_call(
        _qkv_proj_kernel,
        out_shape=jax.ShapeDtypeStruct((P, M, N), xs.dtype),
        grid=(P, M // tm, N // tn, K // tk),
        in_specs=[
            pl.BlockSpec((1, tm, tk), lambda p, i, j, k: (p, i, k)),
            pl.BlockSpec((1, tk, tn), lambda p, i, j, k: (p, k, j)),
        ],
        out_specs=pl.BlockSpec((1, tm, tn), lambda p, i, j, k: (p, i, j)),
        scratch_shapes=[pltpu.VMEM((tm, tn), jnp.float32)],
        compiler_params=pltpu.CompilerParams(
            dimension_semantics=("parallel", "parallel", "parallel",
                                 "arbitrary"),
            vmem_limit_bytes=_VMEM_LIMIT,
        ),
    )(xs, ws)


# ----------------------------------------------------------------------------
# Tiled output projection with bias
# ----------------------------------------------------------------------------
def _linear_bias_kernel(x_ref, w_ref, b_ref, o_ref, acc_ref):
    @pl.when(pl.program_id(2) == 0)
    def _():
        acc_ref[...] = jnp.zeros_like(acc_ref)

    acc_ref[...] += jnp.dot(x_ref[...], w_ref[...],
                            preferred_element_type=jnp.float32)

    @pl.when(pl.program_id(2) == pl.num_programs(2) - 1)
    def _():
        o_ref[...] = (acc_ref[...] + b_ref[...]).astype(o_ref.dtype)


def linear_bias(x, w, b, *, tm=256, tn=256, tk=256):
    """x: (M, K), w: (K, N), b: (N,) -> (M, N)."""
    M, K = x.shape
    N = w.shape[1]
    tm, tn, tk = _pick_tile(M, tm), _pick_tile(N, tn), _pick_tile(K, tk)
    return pl.pallas_call(
        _linear_bias_kernel,
        out_shape=jax.ShapeDtypeStruct((M, N), x.dtype),
        grid=(M // tm, N // tn, K // tk),
        in_specs=[
            pl.BlockSpec((tm, tk), lambda i, j, k: (i, k)),
            pl.BlockSpec((tk, tn), lambda i, j, k: (k, j)),
            pl.BlockSpec((1, tn), lambda i, j, k: (0, j)),
        ],
        out_specs=pl.BlockSpec((tm, tn), lambda i, j, k: (i, j)),
        scratch_shapes=[pltpu.VMEM((tm, tn), jnp.float32)],
        compiler_params=pltpu.CompilerParams(
            dimension_semantics=("parallel", "parallel", "arbitrary"),
            vmem_limit_bytes=_VMEM_LIMIT,
        ),
    )(x, w, b.reshape(1, N))


# ----------------------------------------------------------------------------
# Flash-style multi-head attention core on the (B, N, heads*dim_head) layout
# ----------------------------------------------------------------------------
def _flash_mha_kernel(q_ref, k_ref, v_ref, o_ref, m_sc, l_sc, acc_sc,
                      *, scale, heads, dim_head):
    kv = pl.program_id(2)

    @pl.when(kv == 0)
    def _():
        m_sc[...] = jnp.full_like(m_sc, -jnp.inf)
        l_sc[...] = jnp.zeros_like(l_sc)
        acc_sc[...] = jnp.zeros_like(acc_sc)

    q = q_ref[0, 0]   # (tq,  heads*dim_head)
    k = k_ref[0, 0]   # (tkv, heads*dim_head)
    v = v_ref[0, 0]   # (tkv, heads*dim_head)

    for h in range(heads):
        sl = slice(h * dim_head, (h + 1) * dim_head)
        qh, kh, vh = q[:, sl], k[:, sl], v[:, sl]

        # q @ k^T without an explicit transpose: contract the last dims.
        s = lax.dot_general(qh, kh, (((1,), (1,)), ((), ())),
                            preferred_element_type=jnp.float32) * scale

        m_prev = m_sc[h]                                       # (tq, 1)
        m_new = jnp.maximum(m_prev, s.max(axis=-1, keepdims=True))
        alpha = jnp.exp(m_prev - m_new)
        p = jnp.exp(s - m_new)                                 # (tq, tkv)

        l_sc[h] = alpha * l_sc[h] + p.sum(axis=-1, keepdims=True)
        acc_sc[:, sl] = alpha * acc_sc[:, sl] + jnp.dot(
            p.astype(vh.dtype), vh, preferred_element_type=jnp.float32)
        m_sc[h] = m_new

    @pl.when(kv == pl.num_programs(2) - 1)
    def _():
        for h in range(heads):
            sl = slice(h * dim_head, (h + 1) * dim_head)
            l_h = l_sc[h]
            inv = pl.reciprocal(l_h, approx=True)     # EUP slot
            inv = inv * (2.0 - l_h * inv)             # one Newton step -> ~exact
            acc_sc[:, sl] = acc_sc[:, sl] * inv
        # Single lane-dense (tq, heads*dim_head) store back to HBM.
        o_ref[0] = acc_sc[...].astype(o_ref.dtype)


def flash_mha(qkv, *, heads, dim_head, scale, tq=256, tkv=256):
    """qkv: (3, B, N, heads*dim_head) -> (B, N, heads*dim_head)."""
    _, B, N, HD = qkv.shape
    tq = _pick_tile(N, tq)
    tkv = _pick_tile(N, tkv)
    kernel = functools.partial(_flash_mha_kernel, scale=scale,
                               heads=heads, dim_head=dim_head)
    return pl.pallas_call(
        kernel,
        out_shape=jax.ShapeDtypeStruct((B, N, HD), qkv.dtype),
        grid=(B, N // tq, N // tkv),
        in_specs=[
            pl.BlockSpec((1, 1, tq, HD), lambda b, qi, kv: (0, b, qi, 0)),
            pl.BlockSpec((1, 1, tkv, HD), lambda b, qi, kv: (1, b, kv, 0)),
            pl.BlockSpec((1, 1, tkv, HD), lambda b, qi, kv: (2, b, kv, 0)),
        ],
        out_specs=pl.BlockSpec((1, tq, HD), lambda b, qi, kv: (b, qi, 0)),
        scratch_shapes=[
            pltpu.VMEM((heads, tq, 1), jnp.float32),   # running max
            pltpu.VMEM((heads, tq, 1), jnp.float32),   # running denominator
            pltpu.VMEM((tq, HD), jnp.float32),         # output accumulator
        ],
        compiler_params=pltpu.CompilerParams(
            dimension_semantics=("parallel", "parallel", "arbitrary"),
            vmem_limit_bytes=_VMEM_LIMIT,
        ),
    )(qkv, qkv, qkv)


# ----------------------------------------------------------------------------
# Full Attention module forward (Pallas-backed)
# ----------------------------------------------------------------------------
def attention_forward(params, q, k, v, heads, dim_head):
    """q, k, v: (B, N, dim) -> (B, N, dim)."""
    b, n, dim = q.shape
    inner_dim = heads * dim_head
    scale = dim_head ** (-0.5)

    # Fused Q/K/V projection: one pallas_call over stacked inputs + weights.
    xs = jnp.stack([q, k, v], axis=0).reshape(3, b * n, dim)
    ws = jnp.stack([params["wq"], params["wk"], params["wv"]], axis=0)
    qkv = qkv_projection(xs, ws).reshape(3, b, n, inner_dim)

    # Flash attention directly on the (B, N, heads*dim_head) layout; the head
    # split/merge lives in BlockSpec index maps + static in-kernel slices.
    attn = flash_mha(qkv, heads=heads, dim_head=dim_head, scale=scale)

    # to_out: Linear(inner_dim, dim) + Dropout(0.0) (identity at eval/p=0).
    out = linear_bias(attn.reshape(b * n, inner_dim),
                      params["wo"], params["bo"])
    return out.reshape(b, n, dim)


# ----------------------------------------------------------------------------
# Pure-JAX reference for verification
# ----------------------------------------------------------------------------
def attention_reference(params, q, k, v, heads, dim_head):
    b, n, dim = q.shape
    scale = dim_head ** (-0.5)
    qp = q @ params["wq"]
    kp = k @ params["wk"]
    vp = v @ params["wv"]

    def split(t):
        return t.reshape(b, n, heads, dim_head).transpose(0, 2, 1, 3)

    qh, kh, vh = split(qp), split(kp), split(vp)
    dots = jnp.einsum("bhid,bhjd->bhij", qh, kh) * scale
    attn = jax.nn.softmax(dots, axis=-1)
    out = jnp.einsum("bhij,bhjd->bhid", attn, vh)
    out = out.transpose(0, 2, 1, 3).reshape(b, n, heads * dim_head)
    return out @ params["wo"] + params["bo"]


# ----------------------------------------------------------------------------
if __name__ == "__main__":
    # Small shapes consistent with the module's forward.
    B, N, DIM = 2, 8, 32
    HEADS, DIM_HEAD = 4, 16
    INNER = HEADS * DIM_HEAD   # 64; project_out=True since heads != 1

    key = jax.random.PRNGKey(0)
    kq, kk, kv_, k1, k2, k3, k4, k5 = jax.random.split(key, 8)

    q = jax.random.normal(kq, (B, N, DIM), dtype=jnp.float32)
    k = jax.random.normal(kk, (B, N, DIM), dtype=jnp.float32)
    v = jax.random.normal(kv_, (B, N, DIM), dtype=jnp.float32)

    # Deterministic synthetic weights (stored as (in, out), i.e. W^T of torch).
    params = {
        "wq": jax.random.normal(k1, (DIM, INNER), dtype=jnp.float32) * 0.1,
        "wk": jax.random.normal(k2, (DIM, INNER), dtype=jnp.float32) * 0.1,
        "wv": jax.random.normal(k3, (DIM, INNER), dtype=jnp.float32) * 0.1,
        "wo": jax.random.normal(k4, (INNER, DIM), dtype=jnp.float32) * 0.1,
        "bo": jax.random.normal(k5, (DIM,), dtype=jnp.float32) * 0.1,
    }

    out = attention_forward(params, q, k, v, HEADS, DIM_HEAD)
    out = jax.block_until_ready(out)

    ref = attention_reference(params, q, k, v, HEADS, DIM_HEAD)
    assert out.shape == (B, N, DIM)
    max_err = float(jnp.max(jnp.abs(out - ref)))
    assert jnp.allclose(out, ref, atol=1e-3, rtol=1e-3), (
        f"mismatch vs reference (max abs err {max_err})")

    print("KERNEL_OK")
</pallas_src>

<mosaic_0001>
module attributes {stable_mosaic.version = 11 : i64} {
  func.func @_qkv_proj_kernel(%arg0: i32, %arg1: i32, %arg2: i32, %arg3: i32, %arg4: memref<1x16x32xf32, #tpu.memory_space<vmem>>, %arg5: memref<1x32x64xf32, #tpu.memory_space<vmem>>, %arg6: memref<1x16x64xf32, #tpu.memory_space<vmem>>, %arg7: memref<16x64xf32, #tpu.memory_space<vmem>>) attributes {dimension_semantics = [#tpu.dimension_semantics<parallel>, #tpu.dimension_semantics<parallel>, #tpu.dimension_semantics<parallel>, #tpu.dimension_semantics<arbitrary>], iteration_bounds = array<i64: 3, 1, 1, 1>, scalar_prefetch = 0 : i64, scratch_operands = 1 : i64, tpu.core_type = #tpu.core_type<tc>, window_params = [{transform_indices = @transform_0, window_bounds = array<i64: 1, 16, 32>}, {transform_indices = @transform_1, window_bounds = array<i64: 1, 32, 64>}, {transform_indices = @transform_2, window_bounds = array<i64: 1, 16, 64>}]} {
    %c0_i32 = arith.constant 0 : i32
    %0 = arith.cmpi eq, %arg3, %c0_i32 : i32
    %1 = arith.extui %0 : i1 to i32
    %c0_i32_0 = arith.constant 0 : i32
    %2 = arith.cmpi ne, %1, %c0_i32_0 : i32
    scf.if %2 {
      %cst_12 = arith.constant 0.000000e+00 : f32
      %14 = vector.broadcast %cst_12 : f32 to vector<16x64xf32>
      %c0_13 = arith.constant 0 : index
      %c0_14 = arith.constant 0 : index
      %15 = vector.load %arg7[%c0_13, %c0_14] : memref<16x64xf32, #tpu.memory_space<vmem>>, vector<16x64xf32>
      tpu.vector_store %arg7[%c0_13, %c0_14], %14 {strides = array<i32>} : memref<16x64xf32, #tpu.memory_space<vmem>>, vector<16x64xf32>,
    } else {
    }
    %c0 = arith.constant 0 : index
    %c0_1 = arith.constant 0 : index
    %3 = vector.load %arg7[%c0, %c0_1] : memref<16x64xf32, #tpu.memory_space<vmem>>, vector<16x64xf32>
    %c0_2 = arith.constant 0 : index
    %c0_3 = arith.constant 0 : index
    %c0_4 = arith.constant 0 : index
    %4 = vector.load %arg4[%c0_2, %c0_3, %c0_4] : memref<1x16x32xf32, #tpu.memory_space<vmem>>, vector<1x16x32xf32>
    %5 = vector.shape_cast %4 : vector<1x16x32xf32> to vector<16x32xf32>
    %c0_5 = arith.constant 0 : index
    %c0_6 = arith.constant 0 : index
    %c0_7 = arith.constant 0 : index
    %6 = vector.load %arg5[%c0_5, %c0_6, %c0_7] : memref<1x32x64xf32, #tpu.memory_space<vmem>>, vector<1x32x64xf32>
    %7 = vector.shape_cast %6 : vector<1x32x64xf32> to vector<32x64xf32>
    %cst = arith.constant dense<0.000000e+00> : vector<16x64xf32>
    %8 = tpu.matmul %5, %7, %cst {dimension_numbers = #tpu.dot_dimension_numbers<[1], [0], [0], [1], [0, 0, 1, 1], [], []>} : vector<16x32xf32>, vector<32x64xf32>, vector<16x64xf32> -> vector<16x64xf32>
    %9 = arith.addf %3, %8 : vector<16x64xf32>
    %c0_8 = arith.constant 0 : index
    %c0_9 = arith.constant 0 : index
    %10 = vector.load %arg7[%c0_8, %c0_9] : memref<16x64xf32, #tpu.memory_space<vmem>>, vector<16x64xf32>
    tpu.vector_store %arg7[%c0_8, %c0_9], %9 {strides = array<i32>} : memref<16x64xf32, #tpu.memory_space<vmem>>, vector<16x64xf32>,
    %c0_i32_10 = arith.constant 0 : i32
    %11 = arith.cmpi eq, %arg3, %c0_i32_10 : i32
    %12 = arith.extui %11 : i1 to i32
    %c0_i32_11 = arith.constant 0 : i32
    %13 = arith.cmpi ne, %12, %c0_i32_11 : i32
    scf.if %13 {
      %c0_12 = arith.constant 0 : index
      %c0_13 = arith.constant 0 : index
      %14 = vector.load %arg7[%c0_12, %c0_13] : memref<16x64xf32, #tpu.memory_space<vmem>>, vector<16x64xf32>
      %c0_14 = arith.constant 0 : index
      %c0_15 = arith.constant 0 : index
      %c0_16 = arith.constant 0 : index
      %15 = vector.load %arg6[%c0_14, %c0_15, %c0_16] : memref<1x16x64xf32, #tpu.memory_space<vmem>>, vector<1x16x64xf32>
      %16 = vector.shape_cast %15 : vector<1x16x64xf32> to vector<16x64xf32>
      %17 = vector.shape_cast %14 : vector<16x64xf32> to vector<1x16x64xf32>
      tpu.vector_store %arg6[%c0_14, %c0_15, %c0_16], %17 {strides = array<i32>} : memref<1x16x64xf32, #tpu.memory_space<vmem>>, vector<1x16x64xf32>,
    } else {
    }
    return
  }
  func.func @transform_0(%arg0: i32, %arg1: i32, %arg2: i32, %arg3: i32) -> (i32, i32, i32) {
    %c0_i32 = arith.constant 0 : i32
    return %arg0, %arg1, %arg3 : i32, i32, i32
  }
  func.func @transform_1(%arg0: i32, %arg1: i32, %arg2: i32, %arg3: i32) -> (i32, i32, i32) {
    %c0_i32 = arith.constant 0 : i32
    return %arg0, %arg3, %arg2 : i32, i32, i32
  }
  func.func @transform_2(%arg0: i32, %arg1: i32, %arg2: i32, %arg3: i32) -> (i32, i32, i32) {
    %c0_i32 = arith.constant 0 : i32
    return %arg0, %arg1, %arg2 : i32, i32, i32
  }
}

</mosaic_0001>

<bundles_post_ra>
// kernel: tpu_custom_call.1
= control target key start
LH: loop header
LB: loop body
LE: loop exit
PB: predicated region body
PF: predicated region fallthrough
CT: control target
= control target key end

     0   :  { %7 = vsyncpa [#allocation4], 0  ;;  %s871_s0 = inlined_call_operand.hbm [shape: f32[3,16,32], index: 0, kind: input, shape index: {}]   ;;  %s872_s1 = inlined_call_operand.hbm [shape: f32[3,32,64], index: 1, kind: input, shape index: {}]   ;;  %s873_s2 = inlined_call_operand.hbm [shape: f32[3,16,64], index: 2, kind: output, shape index: {}]  }
   0x1   :  { %9 = vsyncpa [#allocation4 + $0x1], 0 }
   0x2   :  { %10 = vsyncpa [#allocation7], 0 }
   0x3   :  { %12 = vsyncpa [#allocation7 + $0x1], 0 }
   0x4   :  { %13 = vsyncpa [#allocation5], 0 }
   0x5   :  { %15 = vsyncpa [#allocation5 + $0x1], 0  ;;  %s719_s9 = smov 0   ;;  %s721_s10 = smov 0  }
   0x6   :  { %s723_s11 = smov 0   ;;  %s725_s12 = smov 0  }
   0x7   :  { %s727_s13 = smov 0   ;;  %s729_s14 = smov 0  }
   0x8 LB: > { %s451_s15 = sadd.s32 4294967295, %s697_s14   ;;  %s452_s16 = sadd.s32 4294967294, %s697_s14   ;;  %s697_s14 = sphi %s729_s14, %s21_s14   ;;  %s693_s13 = sphi %s727_s13, %s883_s13   ;;  %s689_s12 = sphi %s725_s12, %s882_s12   ;;  %s685_s11 = sphi %s723_s11, %s881_s11   ;;  %s681_s10 = sphi %s721_s10, %s880_s10   ;;  %s677_s9 = sphi %s719_s9, %s879_s9  }
   0x9   : > { %s47_s17 = sadd.s32 1, %s693_s13  ;;  %s58_s18 = sadd.s32 1, %s685_s11 }
   0xa   : > { %p49_p0 = scmp.ge.s32.totalorder %s47_s17, 3  ;;  %p65_p1 = scmp.ne.s32.totalorder %s685_s11, %s681_s10 }
   0xb   : > { %p66_p2 = scmp.eq.s32.totalorder %s697_s14, 0  ;;  %p71_p3 = scmp.ne.s32.totalorder %s681_s10, %s677_s9 }
   0xc   : > { %s885_s17 = smov (%p49_p0, %s47_s17), 0  ;;  %p72_p5 = scmp.eq.s32.totalorder %s451_s15, 0 }
   0xd   : > { %p760_p4 = por %p66_p2, %p65_p1  ;;  %s51_s20 = ssub.s32 %s693_s13, %s885_s17 }
   0xe   : > { %p129_p6 = scmp.eq.s32.totalorder %s451_s15, 2  ;;  %p56_p7 = scmp.eq.s32.totalorder %s51_s20, 0 }
   0xf   : > { %p766_p8 = por %p72_p5, %p71_p3  ;;  %p135_p10 = scmp.eq.s32.totalorder %s452_s16, 2 }
  0x10   : > { %p770_p9 = por %p129_p6, %p65_p1  ;;  %p496_p12 = scmp.lt.s32.totalorder %s697_s14, 3 }
  0x11   : > { %s775_s23 = scalar_select %p56_p7, %s685_s11, %s58_s18  }
  0x12   : > { %p777_p11 = por %p135_p10, %p71_p3  ;;  %s783_s25 = sand.u32 1, %s685_s11  }
  0x13   : > { %s455_s26 = sshll.u32 %s783_s25, 4  ;;  %s472_s27 = sshll.u32 %s693_s13, 4 }
  0x14   : > { %s167_s30 = scalar_lea.hbm %s871_s0, %s472_s27  ;;  %s159_s3 = scalar_lea.vmem [#allocation3], %s455_s26 }
  0x15   : > { %s170_s4 = sshll.u32 %s159_s3, 4  ;;  %s168_s5 = sshll.u32 %s167_s30, 4  ;;  %s171_s4 = int_to_ptr.vmem [resolvable:$true] %s170_s4  ;;  %s169_s5 = int_to_ptr.hbm [resolvable:$true] %s168_s5 }
  0x16   : > { %p792_p13 = pnand %p496_p12, %p760_p4  ;;  %p461_p0 = scmp.ge.s32.totalorder %s697_s14, 1 }
  0x17   : > { %s156_s7 = scalar_lea.sflag [#allocation4], %s783_s25  ;;  %s699_s8 = smov 128  }
  0x18   : > { %s700_s15 = smov 8   ;;  %p203_p1 = scmp.lt.s32.totalorder %s697_s14, 4 }
  0x19   : > { %488 = dma.hbm_to_vmem [thread:$0]  (!%p792_p13), %s169_s5, 256, %s171_s4, %s156_s7, %s699_s8, %s699_s8, %s700_s15  }
  0x1a   : > { %s458_s16 = sshll.u32 %s783_s25, 5  ;;  %s473_s18 = sshll.u32 %s693_s13, 5 }
  0x1b   : > { %p204_p2 = pnand %p461_p0, %p203_p1  ;;  %s192_s19 = scalar_lea.hbm %s872_s1, %s473_s18 }
  0x1c   : > { %s184_s27 = scalar_lea.vmem [#allocation6], %s458_s16  ;;  %s193_s29 = sshll.u32 %s192_s19, 4  ;;  %s194_s29 = int_to_ptr.hbm [resolvable:$true] %s193_s29 }
  0x1d   : > { %s195_s28 = sshll.u32 %s184_s27, 4  ;;  %s181_s30 = scalar_lea.sflag [#allocation7], %s783_s25  ;;  %s196_s28 = int_to_ptr.vmem [resolvable:$true] %s195_s28 }
  0x1e   : > { %491 = dma.hbm_to_vmem [thread:$0]  (!%p792_p13), %s194_s29, 512, %s196_s28, %s181_s30, %s699_s8, %s699_s8, %s700_s15  }
  0x1f   : > { %207 = sbr.rel (%p204_p2) target bundleno = 189 (0xbd), region = 28  ;;  %s810_s3 = sand.u32 (!%p204_p2), 1, %s681_s10  }
  0x20   : > { %s462_s4 = sshll.u32 (!%p204_p2), %s810_s3, 4  ;;  %s210_s5 = scalar_lea.sflag (!%p204_p2), [#allocation4], %s810_s3 }
  0x21   : > { %s213_s7 = scalar_lea.vmem (!%p204_p2), [#allocation3], %s462_s4 }
  0x24   : > { %664 = dma.done.wait (%p766_p8), %s210_s5, 256  }
  0x25   : > { %666 = vsyncadd (%p766_p8), %s210_s5, 4294967040  ;;  %s463_s25 = sshll.u32 %s810_s3, 5  ;;  %s220_s6 = scalar_lea.sflag [#allocation7], %s810_s3 }
  0x26   : > { %s223_s8 = scalar_lea.vmem [#allocation6], %s463_s25 }
  0x27   : > { %668 = dma.done.wait (%p766_p8), %s220_s6, 512  }
  0x28   : > { %670 = vsyncadd (%p766_p8), %s220_s6, 4294966784  ;;  %vm257_vm0 = vcmask 523264   ;;  %v701_v0 = vmov 0.0   ;;  %v267_v1 = vld [vmem:[%s223_s8 + $0x18] sm:$0xff]  ;;  %v266_v2 = vld [vmem:[%s223_s8 + $0x10] sm:$0xff]  ;;  %vm268_vm1 = vcmask 261120  }
  0x29   : > { %258 = vst.msk [vmem:[#allocation2] sm:$0xff] %vm257_vm0, %v701_v0  ;;  %287 = vmatpush.msra.mxu0 %v267_v1  ;;  %475 = vmatpush.msra.mxu1 %v267_v1  ;;  %v265_v3 = vld [vmem:[%s223_s8 + $0x8] sm:$0xff]  ;;  %v264_v4 = vld [vmem:[%s223_s8] sm:$0xff]  ;;  %s474_s21 = sshll.u32 %s689_s12, 4  ;;  %s249_s20 = scalar_lea.vmem [#allocation8], %s462_s4 }
  0x2a   : > { %259 = vst.msk [vmem:[#allocation2 + $0x8] sm:$0xff] %vm257_vm0, %v701_v0  ;;  %v262_v5 = vld [vmem:[%s213_s7] sm:$0xff]  ;;  %v263_v6 = vld [vmem:[%s213_s7 + $0x8] sm:$0xff]  ;;  %s325_s18 = scalar_lea.hbm %s873_s2, %s474_s21  ;;  %s326_s26 = sshll.u32 %s249_s20, 4  ;;  %s327_s26 = int_to_ptr.vmem [resolvable:$true] %s326_s26 }
  0x2b   : > { %288 = vmatpush.msra.mxu0 %v266_v2  ;;  %476 = vmatpush.msra.mxu1 %v266_v2  ;;  %s328_s19 = sshll.u32 %s325_s18, 4  ;;  %s311_s12 = scalar_lea.sflag [#allocation5], %s810_s3  ;;  %s329_s19 = int_to_ptr.hbm [resolvable:$true] %s328_s19 }
  0x2c   : > { %s625_s27 = sshra.s32 %s329_s19, 4  ;;  %s631_s4 = scalar_lea.hbm %s873_s2, 48  ;;  %s626_s27 = int_to_ptr.hbm [resolvable:$true] %s625_s27 }
  0x2d   : > { %289 = vmatpush.msra.mxu0 %v265_v3  ;;  %477 = vmatpush.msra.mxu1 %v265_v3  ;;  %s627_s28 = scalar_lea.hbm %s626_s27, 16  ;;  %p632_p6 = scmp.lt.s32.totalorder %s626_s27, %s873_s2 }
  0x2e   : > { %p628_p3 = scmp.ne.s32.totalorder %s626_s27, %s627_s28  ;;  %p633_p7 = scmp.lt.s32.totalorder %s631_s4, %s627_s28 }
  0x2f   : > { %290 = vmatpush.msra.mxu0 %v264_v4  ;;  %478 = vmatpush.msra.mxu1 %v264_v4 }
  0x30   : > { %465 = vmatmul.msk.f32.vlgmr.msra.gmra.mxu0 %vm268_vm1, %v262_v5  ;;  %466 = vmatmul.msk.f32.vlgmr.msra.gmra.mxu1 %vm268_vm1, %v263_v6  ;;  %v260_v7 = vld [vmem:[#allocation2] sm:$0xff]  ;;  %p629_p4 = pnand %p628_p3, %p770_p9  ;;  %p634_p8 = por %p633_p7, %p632_p6 }
  0x31   : > { %v261_v8 = vld [vmem:[#allocation2 + $0x8] sm:$0xff] }
  0x32   : > { %p630_p5 = pneg %p629_p4 }
  0x34   : > { %p635_p10 = pnand %p634_p8, %p630_p5 }
  0xad   : > { %v292_v9 = vpop.f32.mrf.mxu0  ;;  %v295_v10 = vpop.f32.mrf.mxu1 }
  0xae   : > { %v298_v11 = vadd.f32 %v292_v9, %v260_v7  ;;  %v299_v12 = vadd.f32 %v295_v10, %v261_v8 }
  0xb0   : > { %301 = vst.msk [vmem:[#allocation2] sm:$0xff] %vm257_vm0, %v298_v11 }
  0xb1   : > { %302 = vst.msk [vmem:[#allocation2 + $0x8] sm:$0xff] %vm257_vm0, %v299_v12 }
  0xb7   : > { %v306_v13 = vld [vmem:[#allocation2] sm:$0xff] }
  0xb8   : > { %v307_v14 = vld [vmem:[#allocation2 + $0x8] sm:$0xff]  ;;  %308 = vst.msk [vmem:[%s249_s20] sm:$0xff] %vm257_vm0, %v306_v13 }
  0xb9   : > { %309 = vst.msk [vmem:[%s249_s20 + $0x8] sm:$0xff] %vm257_vm0, %v307_v14 }
  0xba   : > { %638 = shalt.err (!%p635_p10)
}
  0xbb   : > { %s702_s3 = smov 128   ;;  %s703_s25 = smov 8  }
  0xbc   : > { %483 = dma.vmem_to_hbm [thread:$0]  (%p770_p9), %s327_s26, 256, %s329_s19, %s311_s12, %s702_s3, %s702_s3, %s703_s25  }
  0xbd PF: > { %p497_p12 = scmp.ge.s32.totalorder %s697_s14, 2  ;;  %s343_s6 = sand.u32 1, %s677_s9  }
  0xbe   : > { %s344_s8 = scalar_lea.sflag [#allocation5], %s343_s6 }
  0xbf   : > { %p493_p13 = pnand %p497_p12, %p777_p11 }
  0xc1   : > { %p494_p0 = pneg %p493_p13 }
  0xc3   : > { %672 = dma.done.wait (%p494_p0), %s344_s8, 256  }
  0xc4   : > { %674 = vsyncadd (%p494_p0), %s344_s8, 4294967040  ;;  %s21_s14 = sadd.s32 1, %s697_s14   ;;  %s879_s9 = smov %s681_s10 }
  0xc5   : > { %p18_p1 = scmp.ge.s32.totalorder %s21_s14, 5   ;;  %s880_s10 = smov %s685_s11 }
  0xc6   : > { %s881_s11 = smov %s775_s23  ;;  %s882_s12 = smov %s693_s13 }
  0xc7   : > { %s883_s13 = smov %s885_s17  ;;  %20 = sbr.rel (!%p18_p1) target bundleno = 8 (0x8), region = 94 }
  0xcc   :  { %350 = vsyncpa [#allocation4], 1 }
  0xcd   :  { %352 = vsyncpa [#allocation4 + $0x1], 1 }
  0xce   :  { %353 = vsyncpa [#allocation7], 1 }
  0xcf   :  { %355 = vsyncpa [#allocation7 + $0x1], 1 }
  0xd0   :  { %356 = vsyncpa [#allocation5], 1 }
  0xd1   :  { %358 = vsyncpa [#allocation5 + $0x1], 1 }

</bundles_post_ra>
